<compile_context>
chip_gen: v5e
topology: v5e:2x2
jax: 0.10.0
libtpu: 0.0.40
codegen_flags: <defaults>
</compile_context>

<pallas_src>
from typing import NamedTuple

import jax
import jax.numpy as jnp
from jax.experimental import pallas as pl
from jax.experimental.pallas import tpu as pltpu


def _round_up(n, m):
    return ((n + m - 1) // m) * m


# ----------------------------------------------------------------------------
# Hardware-aware planning
# ----------------------------------------------------------------------------
def _hw_info():
    """Returns (gen, vmem_bytes, lane_align, tm_target, two_cores)."""
    vmem = None
    try:
        vmem = int(pltpu.get_tpu_info().vmem_capacity_bytes)
    except Exception:
        vmem = None
    kind = ""
    try:
        kind = jax.devices()[0].device_kind.lower()
    except Exception:
        pass
    if "v5" in kind:
        gen = "v5"
    elif "v6" in kind:
        gen = "v6"
    elif "v7" in kind:
        gen = "v7"
    else:
        gen = "unknown"
    if vmem is None:
        vmem = {"v5": 128 << 20, "v6": 128 << 20, "v7": 64 << 20}.get(gen, 64 << 20)
    # v5e: 4x128x128 MXU -> 128 lane alignment; v6e/v7x: 2x256x256 -> 256.
    lane_align = 128 if gen == "v5" else 256
    # v5e needs only ~240 FLOP/byte (tm=256 suffices); v6e ~650 (tm>=768);
    # v7x ~310 FLOP/byte but only 64 MiB VMEM (tm~512).
    tm_target = {"v5": 256, "v6": 1024, "v7": 512}.get(gen, 512)
    two_cores = gen == "v7"
    return gen, vmem, lane_align, tm_target, two_cores


def _tile_footprint(tm, Cp, th, *, multi, out_itemsize=4):
    """Worst-case VMEM bytes for one pipeline stage (double-buffered tiles)."""
    return (2 * tm * Cp * 2            # x tiles (bf16)
            + 2 * Cp * th * 2          # W1 tiles (bf16)
            + 2 * th * Cp * 2          # W2 tiles (bf16)
            + 2 * 8 * th * 4           # b1 (f32, sublane-padded)
            + 2 * 8 * Cp * 4           # b2 (f32, sublane-padded)
            + 2 * tm * Cp * out_itemsize   # output tiles
            + (tm * Cp * 4 if multi else 0))   # f32 accumulator scratch


def _plan_tiles(C, H, hw):
    """Returns (Cp, Hp, th, tm_target).  th == Hp  =>  resident-weights path."""
    gen, vmem, lane_align, tm_target, two_cores = hw
    Cp = _round_up(C, lane_align)
    Hp_full = _round_up(H, lane_align)
    budget = int(0.70 * vmem)

    # Resident-weights path: whole W1/W2 live in VMEM, DMA'd from HBM once.
    if _tile_footprint(tm_target, Cp, Hp_full, multi=False) <= budget:
        return Cp, Hp_full, Hp_full, tm_target

    # Streamed path: tile the hidden dim, accumulate in f32 scratch.
    th = 512
    while th > lane_align and _tile_footprint(tm_target, Cp, th, multi=True) > budget:
        th //= 2
    tm = tm_target
    while tm > 64 and _tile_footprint(tm, Cp, th, multi=True) > budget:
        tm //= 2
    Hp = _round_up(H, th)
    return Cp, Hp, th, tm


# ----------------------------------------------------------------------------
# Parameter preparation (pad + cast ONCE, outside the per-call wrapper)
# ----------------------------------------------------------------------------
class MLPParams(NamedTuple):
    w1p: jax.Array   # (Cp, Hp) bf16
    b1p: jax.Array   # (1, Hp)  f32
    w2p: jax.Array   # (Hp, Cp) bf16
    b2p: jax.Array   # (1, Cp)  f32
    C: int
    H: int
    Cp: int
    Hp: int
    th: int
    tm_target: int
    vmem_phys: int
    two_cores: bool


def prepare_mlp_params(w1, b1, w2, b2):
    """w1: (C, H), b1: (H,), w2: (H, C), b2: (C,) with H = 4*C."""
    hw = _hw_info()
    _, vmem, _, _, two_cores = hw
    C, H = w1.shape
    Cp, Hp, th, tm_target = _plan_tiles(C, H, hw)

    # Zero padding is mathematically inert for Linear->ReLU->Linear: padded x
    # columns hit zero W1 rows, padded hidden columns have zero bias and zero
    # W2 rows, and padded output columns / rows are sliced off after the call.
    w1p = jnp.pad(w1, ((0, Cp - C), (0, Hp - H))).astype(jnp.bfloat16)
    w2p = jnp.pad(w2, ((0, Hp - H), (0, Cp - C))).astype(jnp.bfloat16)
    b1p = jnp.pad(b1, (0, Hp - H)).reshape(1, Hp).astype(jnp.float32)
    b2p = jnp.pad(b2, (0, Cp - C)).reshape(1, Cp).astype(jnp.float32)
    return MLPParams(w1p, b1p, w2p, b2p, C, H, Cp, Hp, th, tm_target, vmem,
                     two_cores)


# ----------------------------------------------------------------------------
# Kernels
# ----------------------------------------------------------------------------
def mlp_kernel_single(x_ref, w1_ref, b1_ref, w2_ref, b2_ref, o_ref):
    # Whole hidden dim in one tile: no accumulator scratch, direct write.
    h = jnp.dot(x_ref[...], w1_ref[...], preferred_element_type=jnp.float32)
    h = jnp.maximum(h + b1_ref[...], 0.0)
    y = jnp.dot(h.astype(w2_ref.dtype), w2_ref[...],
                preferred_element_type=jnp.float32)
    o_ref[...] = (y + b2_ref[...]).astype(o_ref.dtype)


def mlp_kernel_multi(x_ref, w1_ref, b1_ref, w2_ref, b2_ref, o_ref, acc_ref):
    # Hidden dim tiled across grid axis 1; f32 accumulation in VMEM scratch.
    j = pl.program_id(1)

    @pl.when(j == 0)
    def _():
        acc_ref[...] = jnp.zeros_like(acc_ref)

    h = jnp.dot(x_ref[...], w1_ref[...], preferred_element_type=jnp.float32)
    h = jnp.maximum(h + b1_ref[...], 0.0)
    acc_ref[...] += jnp.dot(h.astype(w2_ref.dtype), w2_ref[...],
                            preferred_element_type=jnp.float32)

    @pl.when(j == pl.num_programs(1) - 1)
    def _():
        o_ref[...] = (acc_ref[...] + b2_ref[...]).astype(o_ref.dtype)


# ----------------------------------------------------------------------------
# Forward wrapper
# ----------------------------------------------------------------------------
def mlp_forward(x, p: MLPParams):
    """x: (B, T, C) -> (B, T, C).  Dropout p=0 => identity."""
    B, T, C = x.shape
    assert C == p.C
    M = B * T
    Cp, Hp, th = p.Cp, p.Hp, p.th
    out_dtype = x.dtype
    out_itemsize = jnp.dtype(out_dtype).itemsize

    # M tile: multiple of 16 (bf16 sublane packing), capped by the plan target.
    tm = min(p.tm_target, _round_up(M, 16))
    # On 2-TC parts make sure the "parallel" M axis has >= 2 tiles to shard.
    if p.two_cores and M >= 512 and _round_up(M, tm) // tm < 2:
        tm = _round_up((M + 1) // 2, 16)
    Mp = _round_up(M, tm)
    n_m = Mp // tm
    n_h = Hp // th

    x2d = jnp.pad(x.reshape(M, C), ((0, Mp - M), (0, Cp - C))).astype(jnp.bfloat16)

    # VMEM limit: derived from the actual tile footprint, clamped to <= 90% of
    # the part's physical VMEM (64 MiB on v7x, 128 MiB on v5e/v6e), with a
    # 32 MiB floor (v5e's default scoped limit is only 16 MiB).
    vmem_est = _tile_footprint(tm, Cp, th, multi=(n_h > 1),
                               out_itemsize=out_itemsize)
    vmem_cap = int(0.9 * p.vmem_phys)
    vmem_limit = min(vmem_cap, max(32 << 20, 2 * vmem_est))

    # Weights are read once (resident path) or once per M-tile (streamed path).
    weight_reads = 1 if n_h == 1 else n_m
    cost = pl.CostEstimate(
        flops=4 * Mp * Cp * Hp,
        transcendentals=0,
        bytes_accessed=(Mp * Cp * 2
                        + (p.w1p.size + p.w2p.size) * 2 * weight_reads
                        + (p.b1p.size + p.b2p.size) * 4
                        + Mp * Cp * out_itemsize))

    if n_h == 1:
        # Resident-weights fast path: 1-D grid over M, grid-invariant weight
        # BlockSpecs (DMA'd once), no accumulator scratch.
        grid = (n_m,)
        in_specs = [
            pl.BlockSpec((tm, Cp), lambda i: (i, 0)),   # x row-tile
            pl.BlockSpec((Cp, Hp), lambda i: (0, 0)),   # full W1 (resident)
            pl.BlockSpec((1, Hp),  lambda i: (0, 0)),   # b1
            pl.BlockSpec((Hp, Cp), lambda i: (0, 0)),   # full W2 (resident)
            pl.BlockSpec((1, Cp),  lambda i: (0, 0)),   # b2
        ]
        out_specs = pl.BlockSpec((tm, Cp), lambda i: (i, 0))
        scratch_shapes = []
        dim_sem = ("parallel",)
        kernel = mlp_kernel_single
    else:
        grid = (n_m, n_h)
        in_specs = [
            pl.BlockSpec((tm, Cp), lambda i, j: (i, 0)),   # x row-tile
            pl.BlockSpec((Cp, th), lambda i, j: (0, j)),   # W1 H-chunk
            pl.BlockSpec((1, th),  lambda i, j: (0, j)),   # b1 H-chunk
            pl.BlockSpec((th, Cp), lambda i, j: (j, 0)),   # W2 H-chunk
            pl.BlockSpec((1, Cp),  lambda i, j: (0, 0)),   # b2
        ]
        out_specs = pl.BlockSpec((tm, Cp), lambda i, j: (i, 0))
        scratch_shapes = [pltpu.VMEM((tm, Cp), jnp.float32)]
        dim_sem = ("parallel", "arbitrary")
        kernel = mlp_kernel_multi

    out2d = pl.pallas_call(
        kernel,
        out_shape=jax.ShapeDtypeStruct((Mp, Cp), out_dtype),
        grid_spec=pltpu.PrefetchScalarGridSpec(
            num_scalar_prefetch=0,
            grid=grid,
            in_specs=in_specs,
            out_specs=out_specs,
            scratch_shapes=scratch_shapes,
        ),
        compiler_params=pltpu.CompilerParams(
            dimension_semantics=dim_sem,
            vmem_limit_bytes=vmem_limit,
        ),
        cost_estimate=cost,
    )(x2d, p.w1p, p.b1p, p.w2p, p.b2p)

    # Padded rows contain b2 (zero x rows still pick up the bias); they are
    # sliced off here, so this is harmless.
    return out2d[:M, :C].reshape(B, T, C)


# ----------------------------------------------------------------------------
# Init + test
# ----------------------------------------------------------------------------
def init_params(key, n_embd):
    """Deterministic init mirroring nn.Linear's U(-1/sqrt(in), 1/sqrt(in))."""
    hidden = 4 * n_embd
    k1, k2, k3, k4 = jax.random.split(key, 4)
    bound1 = 1.0 / (n_embd ** 0.5)
    bound2 = 1.0 / (hidden ** 0.5)
    # stored as (in_features, out_features) == PyTorch weight.T
    w1 = jax.random.uniform(k1, (n_embd, hidden), jnp.float32, -bound1, bound1)
    b1 = jax.random.uniform(k2, (hidden,), jnp.float32, -bound1, bound1)
    w2 = jax.random.uniform(k3, (hidden, n_embd), jnp.float32, -bound2, bound2)
    b2 = jax.random.uniform(k4, (n_embd,), jnp.float32, -bound2, bound2)
    return w1, b1, w2, b2


if __name__ == "__main__":
    # Config: n_embd=32, dropout=0.0; input batch=2, seq=8.
    n_embd = 32
    B, T = 2, 8

    key = jax.random.PRNGKey(0)
    kx, kp = jax.random.split(key)
    x = jax.random.normal(kx, (B, T, n_embd), dtype=jnp.float32)
    w1, b1, w2, b2 = init_params(kp, n_embd)

    params = prepare_mlp_params(w1, b1, w2, b2)   # pad + cast once
    out = mlp_forward(x, params)
    out = jax.block_until_ready(out)

    # Pure-JAX f32 reference; tolerance at bf16-MXU levels.
    ref = jnp.maximum(x.reshape(-1, n_embd) @ w1 + b1, 0.0) @ w2 + b2
    ref = ref.reshape(B, T, n_embd)
    assert out.shape == (B, T, n_embd)
    assert out.dtype == x.dtype
    assert jnp.allclose(out.astype(jnp.float32), ref, atol=3e-2, rtol=3e-2), (
        float(jnp.max(jnp.abs(out.astype(jnp.float32) - ref))))

    print("KERNEL_OK")
</pallas_src>

<mosaic_0001>
module attributes {stable_mosaic.version = 11 : i64} {
  func.func @mlp_kernel_single(%arg0: i32, %arg1: memref<16x256xbf16, #tpu.memory_space<vmem>>, %arg2: memref<256x256xbf16, #tpu.memory_space<vmem>>, %arg3: memref<1x256xf32, #tpu.memory_space<vmem>>, %arg4: memref<256x256xbf16, #tpu.memory_space<vmem>>, %arg5: memref<1x256xf32, #tpu.memory_space<vmem>>, %arg6: memref<16x256xf32, #tpu.memory_space<vmem>>) attributes {dimension_semantics = [#tpu.dimension_semantics<parallel>], iteration_bounds = array<i64: 1>, scalar_prefetch = 0 : i64, scratch_operands = 0 : i64, tpu.core_type = #tpu.core_type<tc>, window_params = [{transform_indices = @transform_0, window_bounds = array<i64: 16, 256>}, {pipeline_mode = #tpu.pipeline_mode<synchronous>, transform_indices = @transform_1, window_bounds = array<i64: 256, 256>}, {pipeline_mode = #tpu.pipeline_mode<synchronous>, transform_indices = @transform_2, window_bounds = array<i64: 1, 256>}, {pipeline_mode = #tpu.pipeline_mode<synchronous>, transform_indices = @transform_3, window_bounds = array<i64: 256, 256>}, {pipeline_mode = #tpu.pipeline_mode<synchronous>, transform_indices = @transform_4, window_bounds = array<i64: 1, 256>}, {transform_indices = @transform_5, window_bounds = array<i64: 16, 256>}]} {
    %c0 = arith.constant 0 : index
    %c0_0 = arith.constant 0 : index
    %0 = vector.load %arg1[%c0, %c0_0] : memref<16x256xbf16, #tpu.memory_space<vmem>>, vector<16x256xbf16>
    %c0_1 = arith.constant 0 : index
    %c0_2 = arith.constant 0 : index
    %1 = vector.load %arg2[%c0_1, %c0_2] : memref<256x256xbf16, #tpu.memory_space<vmem>>, vector<256x256xbf16>
    %cst = arith.constant dense<0.000000e+00> : vector<16x256xf32>
    %2 = tpu.matmul %0, %1, %cst {dimension_numbers = #tpu.dot_dimension_numbers<[1], [0], [0], [1], [0, 0, 1, 1], [], []>} : vector<16x256xbf16>, vector<256x256xbf16>, vector<16x256xf32> -> vector<16x256xf32>
    %c0_3 = arith.constant 0 : index
    %c0_4 = arith.constant 0 : index
    %3 = vector.load %arg3[%c0_3, %c0_4] : memref<1x256xf32, #tpu.memory_space<vmem>>, vector<1x256xf32>
    %4 = vector.broadcast %3 : vector<1x256xf32> to vector<16x256xf32>
    %5 = arith.addf %2, %4 : vector<16x256xf32>
    %cst_5 = arith.constant 0.000000e+00 : f32
    %6 = vector.broadcast %cst_5 : f32 to vector<16x256xf32>
    %7 = arith.maximumf %5, %6 : vector<16x256xf32>
    %8 = arith.truncf %7 : vector<16x256xf32> to vector<16x256xbf16>
    %c0_6 = arith.constant 0 : index
    %c0_7 = arith.constant 0 : index
    %9 = vector.load %arg4[%c0_6, %c0_7] : memref<256x256xbf16, #tpu.memory_space<vmem>>, vector<256x256xbf16>
    %cst_8 = arith.constant dense<0.000000e+00> : vector<16x256xf32>
    %10 = tpu.matmul %8, %9, %cst_8 {dimension_numbers = #tpu.dot_dimension_numbers<[1], [0], [0], [1], [0, 0, 1, 1], [], []>} : vector<16x256xbf16>, vector<256x256xbf16>, vector<16x256xf32> -> vector<16x256xf32>
    %c0_9 = arith.constant 0 : index
    %c0_10 = arith.constant 0 : index
    %11 = vector.load %arg5[%c0_9, %c0_10] : memref<1x256xf32, #tpu.memory_space<vmem>>, vector<1x256xf32>
    %12 = vector.broadcast %11 : vector<1x256xf32> to vector<16x256xf32>
    %13 = arith.addf %10, %12 : vector<16x256xf32>
    %c0_11 = arith.constant 0 : index
    %c0_12 = arith.constant 0 : index
    %14 = vector.load %arg6[%c0_11, %c0_12] : memref<16x256xf32, #tpu.memory_space<vmem>>, vector<16x256xf32>
    tpu.vector_store %arg6[%c0_11, %c0_12], %13 {strides = array<i32>} : memref<16x256xf32, #tpu.memory_space<vmem>>, vector<16x256xf32>,
    return
  }
  func.func @transform_0(%arg0: i32) -> (i32, i32) {
    %c0_i32 = arith.constant 0 : i32
    %c0_i32_0 = arith.constant 0 : i32
    return %arg0, %c0_i32 : i32, i32
  }
  func.func @transform_1(%arg0: i32) -> (i32, i32) {
    %c0_i32 = arith.constant 0 : i32
    %c0_i32_0 = arith.constant 0 : i32
    %c0_i32_1 = arith.constant 0 : i32
    return %c0_i32, %c0_i32_0 : i32, i32
  }
  func.func @transform_2(%arg0: i32) -> (i32, i32) {
    %c0_i32 = arith.constant 0 : i32
    %c0_i32_0 = arith.constant 0 : i32
    %c0_i32_1 = arith.constant 0 : i32
    return %c0_i32, %c0_i32_0 : i32, i32
  }
  func.func @transform_3(%arg0: i32) -> (i32, i32) {
    %c0_i32 = arith.constant 0 : i32
    %c0_i32_0 = arith.constant 0 : i32
    %c0_i32_1 = arith.constant 0 : i32
    return %c0_i32, %c0_i32_0 : i32, i32
  }
  func.func @transform_4(%arg0: i32) -> (i32, i32) {
    %c0_i32 = arith.constant 0 : i32
    %c0_i32_0 = arith.constant 0 : i32
    %c0_i32_1 = arith.constant 0 : i32
    return %c0_i32, %c0_i32_0 : i32, i32
  }
  func.func @transform_5(%arg0: i32) -> (i32, i32) {
    %c0_i32 = arith.constant 0 : i32
    %c0_i32_0 = arith.constant 0 : i32
    return %arg0, %c0_i32 : i32, i32
  }
}

</mosaic_0001>

<bundles_post_ra>
// kernel: tpu_custom_call.1
= control target key start
LH: loop header
LB: loop body
LE: loop exit
PB: predicated region body
PF: predicated region fallthrough
CT: control target
= control target key end

     0   :  { %10 = vsyncpa [#allocation3], 0  ;;  %s1157_s0 = inlined_call_operand.hbm [shape: bf16[16,256], index: 0, kind: input, shape index: {}]   ;;  %s1158_s1 = inlined_call_operand.hbm [shape: bf16[256,256], index: 1, kind: input, shape index: {}]   ;;  %s1159_s2 = inlined_call_operand.hbm [shape: f32[1,256], index: 2, kind: input, shape index: {}]   ;;  %s1160_s3 = inlined_call_operand.hbm [shape: bf16[256,256], index: 3, kind: input, shape index: {}]   ;;  %s1161_s4 = inlined_call_operand.vmem [shape: f32[1,256], index: 4, kind: input, shape index: {}]   ;;  %s1162_s5 = inlined_call_operand.hbm [shape: f32[16,256], index: 5, kind: output, shape index: {}]  }
   0x1   :  { %11 = vsyncpa [#allocation6], 0 }
   0x2   :  { %12 = vsyncpa [#allocation9], 0 }
   0x3   :  { %13 = vsyncpa [#allocation4], 0  ;;  %s31_s20 = sshll.u32 %s1158_s1, 4  ;;  %s1100_s21 = smov [#allocation5]   ;;  %s32_s20 = int_to_ptr.hbm [resolvable:$true] %s31_s20 }
   0x4   :  { %s33_s22 = sshll.u32 %s1100_s21, 4  ;;  %s18_s25 = sshll.u32 %s1157_s0, 4  ;;  %s34_s22 = int_to_ptr.vmem [resolvable:$true] %s33_s22  ;;  %s19_s25 = int_to_ptr.hbm [resolvable:$true] %s18_s25 }
   0x5   :  { %s1101_s26 = smov 128   ;;  %s1102_s27 = smov 8  }
   0x6   :  { %39 = dma.hbm_to_vmem [thread:$0]  %s32_s20, 4096, %s34_s22, [#allocation6], %s1101_s26, %s1101_s26, %s1102_s27  }
   0x7   :  { %s1103_s28 = smov [#allocation2]   ;;  %s45_s7 = sshll.u32 %s1159_s2, 4  ;;  %s46_s7 = int_to_ptr.hbm [resolvable:$true] %s45_s7 }
   0x8   :  { %s20_s29 = sshll.u32 %s1103_s28, 4  ;;  %s55_s9 = sshll.u32 %s1160_s3, 4  ;;  %s21_s29 = int_to_ptr.vmem [resolvable:$true] %s20_s29  ;;  %s56_s9 = int_to_ptr.hbm [resolvable:$true] %s55_s9 }
   0x9   :  { %26 = dma.hbm_to_vmem [thread:$0]  %s19_s25, 256, %s21_s29, [#allocation3], %s1101_s26, %s1101_s26, %s1102_s27  }
   0xa   :  { %s1104_s10 = smov [#allocation7]   ;;  %s1105_s0 = smov [#allocation8]  }
   0xb   :  { %s47_s11 = sshll.u32 %s1104_s10, 4  ;;  %s57_s12 = sshll.u32 %s1105_s0, 4  ;;  %s48_s11 = int_to_ptr.vmem [resolvable:$true] %s47_s11  ;;  %s58_s12 = int_to_ptr.vmem [resolvable:$true] %s57_s12 }
   0xc   :  { %50 = dma.hbm_to_vmem [thread:$0]  %s46_s7, 32, %s48_s11, [#allocation6]  }
   0xd   :  { %63 = dma.hbm_to_vmem [thread:$0]  %s56_s9, 4096, %s58_s12, [#allocation9], %s1101_s26, %s1101_s26, %s1102_s27  }
   0xe   :  { %1092 = dma.done.wait [#allocation3], 256  }
   0xf   :  { %1093 = vsyncadd [#allocation3], 4294967040 }
  0x10   :  { %1094 = dma.done.wait [#allocation6], 4128  }
  0x11   :  { %1095 = vsyncadd [#allocation6], 4294963168 }
  0x12   :  { %1096 = dma.done.wait [#allocation9], 4096  }
  0x13   :  { %1097 = vsyncadd [#allocation9], 4294963200  ;;  %v699_v0 = vld [vmem:[#allocation5 + $0x70] sm:$0xf]  ;;  %v914_v1 = vld [vmem:[#allocation5 + $0x74] sm:$0xf0] }
  0x14   :  { %v763_v2 = vld [vmem:[#allocation5 + $0xf0] sm:$0xf]  ;;  %v700_v3 = vor.u32 %v914_v1, %v699_v0  ;;  %v930_v4 = vld [vmem:[#allocation5 + $0xf4] sm:$0xf0]  ;;  %v913_v5 = vld [vmem:[#allocation5 + $0x74] sm:$0xf] }
  0x15   :  { %v701_v6 = vld [vmem:[#allocation5 + $0x78] sm:$0xf0]  ;;  %v764_v7 = vor.u32 %v930_v4, %v763_v2  ;;  %v929_v9 = vld [vmem:[#allocation5 + $0xf4] sm:$0xf]  ;;  %v691_v11 = vld [vmem:[#allocation5 + $0x60] sm:$0xf] }
  0x16   :  { %v704_v8 = vor.u32 %v913_v5, %v701_v6  ;;  %v765_v10 = vld [vmem:[#allocation5 + $0xf8] sm:$0xf0]  ;;  %292 = vmatpush.bf16.msra.mxu0 %v700_v3  ;;  %v912_v13 = vld [vmem:[#allocation5 + $0x64] sm:$0xf0]  ;;  %v755_v14 = vld [vmem:[#allocation5 + $0xe0] sm:$0xf] }
  0x17   :  { %v768_v12 = vor.u32 %v929_v9, %v765_v10  ;;  %v928_v15 = vld [vmem:[#allocation5 + $0xe4] sm:$0xf0]  ;;  %306 = vmatpush.bf16.msra.mxu1 %v764_v7  ;;  %v692_v16 = vor.u32 %v912_v13, %v691_v11  ;;  %v911_v18 = vld [vmem:[#allocation5 + $0x64] sm:$0xf]  ;;  %v693_v19 = vld [vmem:[#allocation5 + $0x68] sm:$0xf0] }
  0x18   :  { %320 = vmatpush.bf16.msra.mxu2 %v704_v8  ;;  %v756_v17 = vor.u32 %v928_v15, %v755_v14  ;;  %v927_v20 = vld [vmem:[#allocation5 + $0xe4] sm:$0xf]  ;;  %v696_v21 = vor.u32 %v911_v18, %v693_v19  ;;  %v757_v22 = vld [vmem:[#allocation5 + $0xe8] sm:$0xf0]  ;;  %v683_v23 = vld [vmem:[#allocation5 + $0x50] sm:$0xf] }
  0x19   :  { %334 = vmatpush.bf16.msra.mxu3 %v768_v12  ;;  %v910_v24 = vld [vmem:[#allocation5 + $0x54] sm:$0xf0]  ;;  %v760_v25 = vor.u32 %v927_v20, %v757_v22  ;;  %v747_v26 = vld [vmem:[#allocation5 + $0xd0] sm:$0xf]  ;;  %v909_v28 = vld [vmem:[#allocation5 + $0x54] sm:$0xf] }
  0x1a   :  { %v926_v27 = vld [vmem:[#allocation5 + $0xd4] sm:$0xf0]  ;;  %293 = vmatpush.bf16.msra.mxu0 %v692_v16  ;;  %v684_v29 = vor.u32 %v910_v24, %v683_v23  ;;  %v685_v30 = vld [vmem:[#allocation5 + $0x58] sm:$0xf0]  ;;  %v925_v31 = vld [vmem:[#allocation5 + $0xd4] sm:$0xf] }
  0x1b   :  { %v749_v32 = vld [vmem:[#allocation5 + $0xd8] sm:$0xf0]  ;;  %307 = vmatpush.bf16.msra.mxu1 %v756_v17  ;;  %v748_v33 = vor.u32 %v926_v27, %v747_v26  ;;  %v688_v34 = vor.u32 %v909_v28, %v685_v30  ;;  %v675_v35 = vld [vmem:[#allocation5 + $0x40] sm:$0xf]  ;;  %v908_v36 = vld [vmem:[#allocation5 + $0x44] sm:$0xf0] }
  0x1c   :  { %321 = vmatpush.bf16.msra.mxu2 %v696_v21  ;;  %v739_v37 = vld [vmem:[#allocation5 + $0xc0] sm:$0xf]  ;;  %v752_v38 = vor.u32 %v925_v31, %v749_v32  ;;  %v924_v39 = vld [vmem:[#allocation5 + $0xc4] sm:$0xf0]  ;;  %v907_v40 = vld [vmem:[#allocation5 + $0x44] sm:$0xf]  ;;  %v676_v44 = vor.u32 %v908_v36, %v675_v35 }
  0x1d   :  { %335 = vmatpush.bf16.msra.mxu3 %v760_v25  ;;  %v677_v41 = vld [vmem:[#allocation5 + $0x48] sm:$0xf0]  ;;  %v923_v42 = vld [vmem:[#allocation5 + $0xc4] sm:$0xf]  ;;  %v740_v45 = vor.u32 %v924_v39, %v739_v37  ;;  %v667_v47 = vld [vmem:[#allocation5 + $0x30] sm:$0xf] }
  0x1e   :  { %v741_v43 = vld [vmem:[#allocation5 + $0xc8] sm:$0xf0]  ;;  %294 = vmatpush.bf16.msra.mxu0 %v684_v29  ;;  %v680_v46 = vor.u32 %v907_v40, %v677_v41  ;;  %v906_v48 = vld [vmem:[#allocation5 + $0x34] sm:$0xf0]  ;;  %v731_v49 = vld [vmem:[#allocation5 + $0xb0] sm:$0xf] }
  0x1f   :  { %308 = vmatpush.bf16.msra.mxu1 %v748_v33  ;;  %v744_v50 = vor.u32 %v923_v42, %v741_v43  ;;  %v922_v51 = vld [vmem:[#allocation5 + $0xb4] sm:$0xf0]  ;;  %v905_v52 = vld [vmem:[#allocation5 + $0x34] sm:$0xf]  ;;  %v669_v53 = vld [vmem:[#allocation5 + $0x38] sm:$0xf0]  ;;  %v668_v56 = vor.u32 %v906_v48, %v667_v47 }
  0x20   :  { %322 = vmatpush.bf16.msra.mxu2 %v688_v34  ;;  %v921_v54 = vld [vmem:[#allocation5 + $0xb4] sm:$0xf]  ;;  %v733_v55 = vld [vmem:[#allocation5 + $0xb8] sm:$0xf0]  ;;  %v732_v57 = vor.u32 %v922_v51, %v731_v49  ;;  %v672_v58 = vor.u32 %v905_v52, %v669_v53  ;;  %v659_v59 = vld [vmem:[#allocation5 + $0x20] sm:$0xf] }
  0x21   :  { %336 = vmatpush.bf16.msra.mxu3 %v752_v38  ;;  %v904_v60 = vld [vmem:[#allocation5 + $0x24] sm:$0xf0]  ;;  %v723_v61 = vld [vmem:[#allocation5 + $0xa0] sm:$0xf]  ;;  %v736_v62 = vor.u32 %v921_v54, %v733_v55  ;;  %v903_v0 = vld [vmem:[#allocation5 + $0x24] sm:$0xf] }
  0x22   :  { %295 = vmatpush.bf16.msra.mxu0 %v676_v44  ;;  %v920_v63 = vld [vmem:[#allocation5 + $0xa4] sm:$0xf0]  ;;  %v661_v1 = vld [vmem:[#allocation5 + $0x28] sm:$0xf0]  ;;  %v919_v2 = vld [vmem:[#allocation5 + $0xa4] sm:$0xf]  ;;  %v660_v4 = vor.u32 %v904_v60, %v659_v59 }
  0x23   :  { %309 = vmatpush.bf16.msra.mxu1 %v740_v45  ;;  %v725_v3 = vld [vmem:[#allocation5 + $0xa8] sm:$0xf0]  ;;  %v724_v5 = vor.u32 %v920_v63, %v723_v61  ;;  %v664_v6 = vor.u32 %v903_v0, %v661_v1  ;;  %v651_v7 = vld [vmem:[#allocation5 + $0x10] sm:$0xf]  ;;  %v902_v8 = vld [vmem:[#allocation5 + $0x14] sm:$0xf0] }
  0x24   :  { %323 = vmatpush.bf16.msra.mxu2 %v680_v46  ;;  %v715_v9 = vld [vmem:[#allocation5 + $0x90] sm:$0xf]  ;;  %v728_v10 = vor.u32 %v919_v2, %v725_v3  ;;  %v918_v11 = vld [vmem:[#allocation5 + $0x94] sm:$0xf0]  ;;  %v901_v12 = vld [vmem:[#allocation5 + $0x14] sm:$0xf]  ;;  %v652_v16 = vor.u32 %v902_v8, %v651_v7 }
  0x25   :  { %337 = vmatpush.bf16.msra.mxu3 %v744_v50  ;;  %v653_v13 = vld [vmem:[#allocation5 + $0x18] sm:$0xf0]  ;;  %v917_v14 = vld [vmem:[#allocation5 + $0x94] sm:$0xf]  ;;  %v643_v17 = vld [vmem:[#allocation5] sm:$0xf]  ;;  %v716_v19 = vor.u32 %v918_v11, %v715_v9 }
  0x26   :  { %296 = vmatpush.bf16.msra.mxu0 %v668_v56  ;;  %v717_v15 = vld [vmem:[#allocation5 + $0x98] sm:$0xf0]  ;;  %v900_v18 = vld [vmem:[#allocation5 + $0x4] sm:$0xf0]  ;;  %v656_v20 = vor.u32 %v901_v12, %v653_v13  ;;  %v707_v21 = vld [vmem:[#allocation5 + $0x80] sm:$0xf] }
  0x27   :  { %310 = vmatpush.bf16.msra.mxu1 %v732_v57  ;;  %v916_v22 = vld [vmem:[#allocation5 + $0x84] sm:$0xf0]  ;;  %v899_v23 = vld [vmem:[#allocation5 + $0x4] sm:$0xf]  ;;  %v720_v24 = vor.u32 %v917_v14, %v717_v15  ;;  %v645_v25 = vld [vmem:[#allocation5 + $0x8] sm:$0xf0]  ;;  %v644_v31 = vor.u32 %v900_v18, %v643_v17 }
  0x28   :  { %324 = vmatpush.bf16.msra.mxu2 %v672_v58  ;;  %v915_v26 = vld [vmem:[#allocation5 + $0x84] sm:$0xf]  ;;  %v709_v27 = vld [vmem:[#allocation5 + $0x88] sm:$0xf0]  ;;  %v635_v28 = vld [vmem:[#allocation2] sm:$0xf]  ;;  %v708_v35 = vor.u32 %v916_v22, %v707_v21  ;;  %v648_v36 = vor.u32 %v899_v23, %v645_v25 }
  0x29   :  { %338 = vmatpush.bf16.msra.mxu3 %v736_v62  ;;  %v827_v29 = vld [vmem:[#allocation8 + $0x70] sm:$0xf]  ;;  %v946_v30 = vld [vmem:[#allocation8 + $0x74] sm:$0xf0]  ;;  %v945_v33 = vld [vmem:[#allocation8 + $0x74] sm:$0xf]  ;;  %v712_v39 = vor.u32 %v915_v26, %v709_v27 }
  0x2a   :  { %297 = vmatpush.bf16.msra.mxu0 %v660_v4  ;;  %v898_v32 = vld [vmem:[#allocation2 + $0x4] sm:$0xf0]  ;;  %v829_v34 = vld [vmem:[#allocation8 + $0x78] sm:$0xf0]  ;;  %v897_v37 = vld [vmem:[#allocation2 + $0x4] sm:$0xf]  ;;  %v828_v40 = vor.u32 %v946_v30, %v827_v29 }
  0x2b   :  { %311 = vmatpush.bf16.msra.mxu1 %v724_v5  ;;  %v637_v38 = vld [vmem:[#allocation2 + $0x8] sm:$0xf0]  ;;  %v819_v41 = vld [vmem:[#allocation8 + $0x60] sm:$0xf]  ;;  %v891_v42 = vld [vmem:[#allocation8 + $0xf0] sm:$0xf]  ;;  %v636_v44 = vor.u32 %v898_v32, %v635_v28  ;;  %v832_v45 = vor.u32 %v945_v33, %v829_v34 }
  0x2c   :  { %325 = vmatpush.bf16.msra.mxu2 %v664_v6  ;;  %v962_v43 = vld [vmem:[#allocation8 + $0xf4] sm:$0xf0]  ;;  %v944_v46 = vld [vmem:[#allocation8 + $0x64] sm:$0xf0]  ;;  %v961_v47 = vld [vmem:[#allocation8 + $0xf4] sm:$0xf]  ;;  %v640_v49 = vor.u32 %v897_v37, %v637_v38 }
  0x2d   :  { %339 = vmatpush.bf16.msra.mxu3 %v728_v10  ;;  %v893_v48 = vld [vmem:[#allocation8 + $0xf8] sm:$0xf0]  ;;  %v943_v50 = vld [vmem:[#allocation8 + $0x64] sm:$0xf]  ;;  %v821_v51 = vld [vmem:[#allocation8 + $0x68] sm:$0xf0]  ;;  %v892_v52 = vor.u32 %v962_v43, %v891_v42  ;;  %v820_v53 = vor.u32 %v944_v46, %v819_v41 }
  0x2e   :  { %298 = vmatpush.bf16.msra.mxu0 %v652_v16  ;;  %v896_v54 = vor.u32 %v961_v47, %v893_v48  ;;  %v811_v55 = vld [vmem:[#allocation8 + $0x50] sm:$0xf]  ;;  %v883_v56 = vld [vmem:[#allocation8 + $0xe0] sm:$0xf]  ;;  %v960_v57 = vld [vmem:[#allocation8 + $0xe4] sm:$0xf0]  ;;  %v824_v58 = vor.u32 %v943_v50, %v821_v51 }
  0x2f   :  { %312 = vmatpush.bf16.msra.mxu1 %v716_v19  ;;  %v942_v59 = vld [vmem:[#allocation8 + $0x54] sm:$0xf0]  ;;  %v959_v60 = vld [vmem:[#allocation8 + $0xe4] sm:$0xf]  ;;  %v885_v61 = vld [vmem:[#allocation8 + $0xe8] sm:$0xf0]  ;;  %v884_v0 = vor.u32 %v960_v57, %v883_v56 }
  0x30   :  { %326 = vmatpush.bf16.msra.mxu2 %v656_v20  ;;  %v941_v62 = vld [vmem:[#allocation8 + $0x54] sm:$0xf]  ;;  %v813_v63 = vld [vmem:[#allocation8 + $0x58] sm:$0xf0]  ;;  %v812_v1 = vor.u32 %v942_v59, %v811_v55  ;;  %v888_v2 = vor.u32 %v959_v60, %v885_v61  ;;  %v803_v4 = vld [vmem:[#allocation8 + $0x40] sm:$0xf] }
  0x31   :  { %340 = vmatpush.bf16.msra.mxu3 %v720_v24  ;;  %v816_v3 = vor.u32 %v941_v62, %v813_v63  ;;  %v940_v5 = vld [vmem:[#allocation8 + $0x44] sm:$0xf0]  ;;  %v939_v6 = vld [vmem:[#allocation8 + $0x44] sm:$0xf]  ;;  %v805_v7 = vld [vmem:[#allocation8 + $0x48] sm:$0xf0] }
  0x32   :  { %299 = vmatpush.bf16.msra.mxu0 %v644_v31  ;;  %v804_v8 = vor.u32 %v940_v5, %v803_v4  ;;  %v808_v9 = vor.u32 %v939_v6, %v805_v7  ;;  %v875_v10 = vld [vmem:[#allocation8 + $0xd0] sm:$0xf]  ;;  %v958_v11 = vld [vmem:[#allocation8 + $0xd4] sm:$0xf0]  ;;  %v957_v12 = vld [vmem:[#allocation8 + $0xd4] sm:$0xf] }
  0x33   :  { %313 = vmatpush.bf16.msra.mxu1 %v708_v35  ;;  %v876_v13 = vor.u32 %v958_v11, %v875_v10  ;;  %v877_v14 = vld [vmem:[#allocation8 + $0xd8] sm:$0xf0]  ;;  %v795_v16 = vld [vmem:[#allocation8 + $0x30] sm:$0xf]  ;;  %v938_v17 = vld [vmem:[#allocation8 + $0x34] sm:$0xf0] }
  0x34   :  { %327 = vmatpush.bf16.msra.mxu2 %v648_v36  ;;  %v880_v15 = vor.u32 %v957_v12, %v877_v14  ;;  %v937_v18 = vld [vmem:[#allocation8 + $0x34] sm:$0xf]  ;;  %v796_v19 = vor.u32 %v938_v17, %v795_v16  ;;  %v797_v20 = vld [vmem:[#allocation8 + $0x38] sm:$0xf0]  ;;  %v867_v22 = vld [vmem:[#allocation8 + $0xc0] sm:$0xf] }
  0x35   :  { %341 = vmatpush.bf16.msra.mxu3 %v712_v39  ;;  %300 = vmatmul.bf16.vlgmr.msra.gmra.mxu0 %v636_v44  ;;  %v800_v21 = vor.u32 %v937_v18, %v797_v20  ;;  %v956_v23 = vld [vmem:[#allocation8 + $0xc4] sm:$0xf0]  ;;  %v955_v24 = vld [vmem:[#allocation8 + $0xc4] sm:$0xf]  ;;  %v869_v26 = vld [vmem:[#allocation8 + $0xc8] sm:$0xf0] }
  0x36   :  { %552 = vmatpush.bf16.msrb.mxu0 %v828_v40  ;;  %314 = vmatmul.bf16.vlgmr.msra.gmra.mxu1 %v640_v49  ;;  %v868_v25 = vor.u32 %v956_v23, %v867_v22  ;;  %v872_v27 = vor.u32 %v955_v24, %v869_v26  ;;  %v787_v28 = vld [vmem:[#allocation8 + $0x20] sm:$0xf]  ;;  %v936_v29 = vld [vmem:[#allocation8 + $0x24] sm:$0xf0]  ;;  %v935_v31 = vld [vmem:[#allocation8 + $0x24] sm:$0xf] }
  0x37   :  { %328 = vmatmul.bf16.vlgmr.msra.gmra.mxu2 %v636_v44  ;;  %566 = vmatpush.bf16.msrb.mxu1 %v892_v52  ;;  %v788_v30 = vor.u32 %v936_v29, %v787_v28  ;;  %v789_v32 = vld [vmem:[#allocation8 + $0x28] sm:$0xf0]  ;;  %v859_v34 = vld [vmem:[#allocation8 + $0xb0] sm:$0xf]  ;;  %v954_v35 = vld [vmem:[#allocation8 + $0xb4] sm:$0xf0] }
  0x38   :  { %580 = vmatpush.bf16.msrb.mxu2 %v832_v45  ;;  %342 = vmatmul.bf16.vlgmr.msra.gmra.mxu3 %v640_v49  ;;  %v792_v33 = vor.u32 %v935_v31, %v789_v32  ;;  %v953_v36 = vld [vmem:[#allocation8 + $0xb4] sm:$0xf]  ;;  %v860_v37 = vor.u32 %v954_v35, %v859_v34  ;;  %v861_v38 = vld [vmem:[#allocation8 + $0xb8] sm:$0xf0]  ;;  %v779_v40 = vld [vmem:[#allocation8 + $0x10] sm:$0xf] }
  0x39   :  { %594 = vmatpush.bf16.msrb.mxu3 %v896_v54  ;;  %v864_v39 = vor.u32 %v953_v36, %v861_v38  ;;  %v934_v41 = vld [vmem:[#allocation8 + $0x14] sm:$0xf0]  ;;  %v933_v42 = vld [vmem:[#allocation8 + $0x14] sm:$0xf]  ;;  %v781_v44 = vld [vmem:[#allocation8 + $0x18] sm:$0xf0] }
  0x3a   :  { %553 = vmatpush.bf16.msrb.mxu0 %v820_v53  ;;  %v780_v43 = vor.u32 %v934_v41, %v779_v40  ;;  %v784_v45 = vor.u32 %v933_v42, %v781_v44  ;;  %v851_v46 = vld [vmem:[#allocation8 + $0xa0] sm:$0xf]  ;;  %v952_v47 = vld [vmem:[#allocation8 + $0xa4] sm:$0xf0]  ;;  %v951_v48 = vld [vmem:[#allocation8 + $0xa4] sm:$0xf] }
  0x3b   :  { %567 = vmatpush.bf16.msrb.mxu1 %v884_v0  ;;  %v852_v49 = vor.u32 %v952_v47, %v851_v46  ;;  %v853_v50 = vld [vmem:[#allocation8 + $0xa8] sm:$0xf0]  ;;  %v771_v52 = vld [vmem:[#allocation8] sm:$0xf]  ;;  %v932_v53 = vld [vmem:[#allocation8 + $0x4] sm:$0xf0] }
  0x3c   :  { %581 = vmatpush.bf16.msrb.mxu2 %v824_v58  ;;  %v856_v51 = vor.u32 %v951_v48, %v853_v50  ;;  %v931_v54 = vld [vmem:[#allocation8 + $0x4] sm:$0xf]  ;;  %v772_v55 = vor.u32 %v932_v53, %v771_v52  ;;  %v773_v56 = vld [vmem:[#allocation8 + $0x8] sm:$0xf0]  ;;  %v843_v58 = vld [vmem:[#allocation8 + $0x90] sm:$0xf] }
  0x3d   :  { %595 = vmatpush.bf16.msrb.mxu3 %v888_v2  ;;  %v776_v57 = vor.u32 %v931_v54, %v773_v56  ;;  %v950_v59 = vld [vmem:[#allocation8 + $0x94] sm:$0xf0]  ;;  %v949_v60 = vld [vmem:[#allocation8 + $0x94] sm:$0xf]  ;;  %v845_v62 = vld [vmem:[#allocation8 + $0x98] sm:$0xf0] }
  0x3e   :  { %554 = vmatpush.bf16.msrb.mxu0 %v812_v1  ;;  %v844_v61 = vor.u32 %v950_v59, %v843_v58  ;;  %v848_v63 = vor.u32 %v949_v60, %v845_v62  ;;  %v835_v0 = vld [vmem:[#allocation8 + $0x80] sm:$0xf]  ;;  %v948_v1 = vld [vmem:[#allocation8 + $0x84] sm:$0xf0]  ;;  %v947_v2 = vld [vmem:[#allocation8 + $0x84] sm:$0xf] }
  0x3f   :  { %568 = vmatpush.bf16.msrb.mxu1 %v876_v13  ;;  %v837_v4 = vld [vmem:[#allocation8 + $0x88] sm:$0xf0]  ;;  %v116_v6 = vld [vmem:[#allocation7] sm:$0x3]  ;;  %s1106_s13 = smov [#allocation10]   ;;  %s618_s16 = sshll.u32 %s1162_s5, 4  ;;  %s619_s16 = int_to_ptr.hbm [resolvable:$true] %s618_s16 }
  0x40   :  { %582 = vmatpush.bf16.msrb.mxu2 %v816_v3  ;;  %v836_v3 = vor.u32 %v948_v1, %v835_v0  ;;  %v840_v5 = vor.u32 %v947_v2, %v837_v4  ;;  %v119_v12 = vperm.slane %v116_v6, 1  ;;  %v386_v31 = vld [vmem:[%s1161_s4] sm:$0x3]  ;;  %s616_s4 = sshll.u32 %s1106_s13, 4  ;;  %s1107_s17 = smov 256   ;;  %s617_s4 = int_to_ptr.vmem [resolvable:$true] %s616_s4 }
  0x41   :  { %596 = vmatpush.bf16.msrb.mxu3 %v880_v15  ;;  %v389_v38 = vperm.slane %v386_v31, 1  ;;  %s1108_s18 = smov 16  }
  0x42   :  { %555 = vmatpush.bf16.msrb.mxu0 %v804_v8  ;;  %v118_v8 = vperm.slane %v116_v6, 0 }
  0x43   :  { %569 = vmatpush.bf16.msrb.mxu1 %v868_v25 }
  0x44   :  { %583 = vmatpush.bf16.msrb.mxu2 %v808_v9 }
  0x45   :  { %597 = vmatpush.bf16.msrb.mxu3 %v872_v27 }
  0x46   :  { %556 = vmatpush.bf16.msrb.mxu0 %v796_v19 }
  0x47   :  { %570 = vmatpush.bf16.msrb.mxu1 %v860_v37 }
  0x48   :  { %584 = vmatpush.bf16.msrb.mxu2 %v800_v21 }
  0x49   :  { %598 = vmatpush.bf16.msrb.mxu3 %v864_v39 }
  0x4a   :  { %557 = vmatpush.bf16.msrb.mxu0 %v788_v30 }
  0x4b   :  { %571 = vmatpush.bf16.msrb.mxu1 %v852_v49 }
  0x4c   :  { %585 = vmatpush.bf16.msrb.mxu2 %v792_v33  ;;  %v388_v33 = vperm.slane %v386_v31, 0 }
  0x4d   :  { %599 = vmatpush.bf16.msrb.mxu3 %v856_v51 }
  0x4e   :  { %558 = vmatpush.bf16.msrb.mxu0 %v780_v43 }
  0x4f   :  { %572 = vmatpush.bf16.msrb.mxu1 %v844_v61 }
  0x50   :  { %586 = vmatpush.bf16.msrb.mxu2 %v784_v45 }
  0x51   :  { %600 = vmatpush.bf16.msrb.mxu3 %v848_v63 }
  0x52   :  { %559 = vmatpush.bf16.msrb.mxu0 %v772_v55 }
  0x53   :  { %573 = vmatpush.bf16.msrb.mxu1 %v836_v3 }
  0x54   :  { %587 = vmatpush.bf16.msrb.mxu2 %v776_v57 }
  0x55   :  { %601 = vmatpush.bf16.msrb.mxu3 %v840_v5 }
  0xb2   :  { %v301_v7 = vpop.f32.mrf.mxu0 }
  0xb3   :  { %v315_v9 = vpop.f32.mrf.mxu1  ;;  %v302_v10 = vadd.f32 %v301_v7, %v118_v8 }
  0xb5   :  { %v316_v15 = vadd.f32 %v315_v9, %v302_v10 }
  0xb7   :  { %v348_v20 = vmax.f32 %v316_v15, 0.0 }
  0xba   :  { %v329_v11 = vpop.f32.mrf.mxu2  ;;  %v303_v14 = vpop.f32.mrf.mxu0 }
  0xbb   :  { %v343_v13 = vpop.f32.mrf.mxu3  ;;  %v304_v16 = vadd.f32 %v303_v14, %v118_v8  ;;  %v317_v17 = vpop.f32.mrf.mxu1  ;;  %v330_v19 = vadd.f32 %v329_v11, %v119_v12 }
  0xbd   :  { %v318_v18 = vadd.f32 %v317_v17, %v304_v16  ;;  %v344_v24 = vadd.f32 %v343_v13, %v330_v19 }
  0xbf   :  { %v350_v21 = vmax.f32 %v318_v18, 0.0  ;;  %v349_v28 = vmax.f32 %v344_v24, 0.0 }
  0xc1   :  { %v352_v22 = vpack.c.bf16 %v350_v21, %v348_v20 }
  0xc2   :  { %v331_v23 = vpop.f32.mrf.mxu2 }
  0xc3   :  { %v332_v25 = vadd.f32 %v331_v23, %v119_v12  ;;  %v345_v26 = vpop.f32.mrf.mxu3  ;;  %560 = vmatmul.bf16.vlgmr.msrb.gmra.mxu0 %v352_v22  ;;  %588 = vmatmul.bf16.vlgmr.msrb.gmra.mxu2 %v352_v22 }
  0xc5   :  { %v346_v27 = vadd.f32 %v345_v26, %v332_v25 }
  0xc7   :  { %v351_v29 = vmax.f32 %v346_v27, 0.0 }
  0xc9   :  { %v353_v30 = vpack.c.bf16 %v351_v29, %v349_v28 }
  0xcb   :  { %574 = vmatmul.bf16.vlgmr.msrb.gmra.mxu1 %v353_v30  ;;  %602 = vmatmul.bf16.vlgmr.msrb.gmra.mxu3 %v353_v30 }
 0x140   :  { %v561_v32 = vpop.f32.mrf.mxu0 }
 0x141   :  { %v562_v34 = vadd.f32 %v561_v32, %v388_v33 }
 0x146   :  { %v589_v36 = vpop.f32.mrf.mxu2 }
 0x147   :  { %v590_v40 = vadd.f32 %v589_v36, %v389_v38 }
 0x148   :  { %v575_v35 = vpop.f32.mrf.mxu1  ;;  %v563_v39 = vpop.f32.mrf.mxu0 }
 0x149   :  { %v576_v37 = vadd.f32 %v575_v35, %v562_v34  ;;  %v564_v42 = vadd.f32 %v563_v39, %v388_v33 }
 0x14b   :  { %608 = vst [vmem:[#allocation10] sm:$0xff] %v576_v37 }
 0x14e   :  { %v603_v41 = vpop.f32.mrf.mxu3  ;;  %v591_v46 = vpop.f32.mrf.mxu2 }
 0x14f   :  { %v604_v43 = vadd.f32 %v603_v41, %v590_v40  ;;  %v592_v47 = vadd.f32 %v591_v46, %v389_v38 }
 0x150   :  { %v577_v44 = vpop.f32.mrf.mxu1 }
 0x151   :  { %609 = vst [vmem:[#allocation10 + $0x8] sm:$0xff] %v604_v43  ;;  %v578_v45 = vadd.f32 %v577_v44, %v564_v42 }
 0x153   :  { %610 = vst [vmem:[#allocation10 + $0x10] sm:$0xff] %v578_v45 }
 0x156   :  { %v605_v48 = vpop.f32.mrf.mxu3 }
 0x157   :  { %v606_v49 = vadd.f32 %v605_v48, %v592_v47 }
 0x159   :  { %611 = vst [vmem:[#allocation10 + $0x18] sm:$0xff] %v606_v49 }
 0x15a   :  { %624 = dma.vmem_to_hbm [thread:$0]  %s617_s4, 512, %s619_s16, [#allocation4], %s1107_s17, %s1107_s17, %s1108_s18  }
 0x15b   :  { %1098 = dma.done.wait [#allocation4], 512  }
 0x15c   :  { %1099 = vsyncadd [#allocation4], 4294966784 }
 0x15d   :  { %629 = vsyncpa [#allocation3], 1 }
 0x15e   :  { %630 = vsyncpa [#allocation6], 1 }
 0x15f   :  { %631 = vsyncpa [#allocation9], 1 }
 0x160   :  { %632 = vsyncpa [#allocation4], 1 }

</bundles_post_ra>
